<compile_context>
chip_gen: v5e
topology: v5e:2x2
jax: 0.10.0
libtpu: 0.0.40
codegen_flags: <defaults>
</compile_context>

<pallas_src>
import functools

import jax
import jax.numpy as jnp
import numpy as np
from jax.experimental import pallas as pl
from jax.experimental.pallas import tpu as pltpu

LN_EPS = 1e-5


def _rate_embedding_kernel(x_ref, w1_ref, b1_ref, gamma_ref, beta_ref,
                           w2_ref, b2_ref, out_ref):
    x = x_ref[...]                                    # (TB, H) f32
    H = x.shape[-1]
    M = out_ref.shape[-1]
    inv_h = 1.0 / H

    # Fused first-layer matmul for all M heads on the MXU:
    # (TB, H) @ (H, M*H) -> (TB, M*H).  Weights already (in, out) and stacked;
    # x is cast to the weight dtype (bf16 by default), accumulation is f32.
    y_all = jnp.dot(x.astype(w1_ref.dtype), w1_ref[...],
                    preferred_element_type=jnp.float32) + b1_ref[...]

    gamma = gamma_ref[...]                            # (1, H)  shared LayerNorm
    beta = beta_ref[...]
    w2 = w2_ref[...]                                  # (M, H)  f32, per-head rows

    # Per-metric residual + LayerNorm + ReLU + H->1 projection on lane-aligned
    # H-wide slices (H is a multiple of 128, so slices never cross a (8,128) tile).
    logit_cols = []
    for m in range(M):                                # static unroll, M is small
        y_m = y_all[:, m * H:(m + 1) * H] + x         # residual (f32)
        # Single-pass LN statistics: var = E[y^2] - mean^2.
        s1 = jnp.sum(y_m, axis=-1, keepdims=True)
        s2 = jnp.sum(y_m * y_m, axis=-1, keepdims=True)
        mean = s1 * inv_h
        var = s2 * inv_h - mean * mean
        ln = (y_m - mean) * jax.lax.rsqrt(var + LN_EPS)
        h_m = jnp.maximum(ln * gamma + beta, 0.0)     # (TB, H)
        # H -> 1 projection on VPU + XLU (idle slots here); keeps everything f32.
        logit_cols.append(jnp.sum(h_m * w2[m:m + 1, :], axis=-1, keepdims=True))

    logits = jnp.concatenate(logit_cols, axis=-1) + b2_ref[...]   # (TB, M)
    out_ref[...] = jax.nn.sigmoid(logits)


def pack_rate_embedding_params(w1, b1, gamma, beta, w2, b2, *,
                               w1_dtype=jnp.bfloat16):
    """Pack / pre-transpose weights ONCE (call at load time, not per forward).

    w1: [M, H, H] (torch Linear layout: out x in); b1: [M, H];
    gamma/beta: [1, H] or [H] (shared LayerNorm); w2: [M, H]; b2: [M, 1].
    """
    M, H, _ = w1.shape
    # w1_all[i, m*H + o] = w1[m, o, i]  -> (H_in, M*H_out); avoids in-kernel transpose.
    w1_all = jnp.transpose(w1, (2, 0, 1)).reshape(H, M * H).astype(w1_dtype)
    b1_all = b1.reshape(1, M * H).astype(jnp.float32)
    gamma2 = jnp.asarray(gamma).reshape(1, H).astype(jnp.float32)
    beta2 = jnp.asarray(beta).reshape(1, H).astype(jnp.float32)
    w2_all = jnp.asarray(w2).reshape(M, H).astype(jnp.float32)     # stays f32
    b2_all = jnp.asarray(b2).reshape(1, M).astype(jnp.float32)
    return (w1_all, b1_all, gamma2, beta2, w2_all, b2_all)


def rate_embedding(x, packed_params, *, block_b=None):
    """x: [B, H]; packed_params from pack_rate_embedding_params.
    Returns [M, B, 1] == the list of M tensors of shape [B, 1]."""
    w1_all, b1_all, gamma2, beta2, w2_all, b2_all = packed_params
    B, H = x.shape
    M = w2_all.shape[0]
    assert w1_all.shape == (H, M * H)

    if block_b is None:
        if B >= 16:
            # >=2 grid steps so v7x's 2 TensorCores both get work; cap per-step rows
            # at 128 to keep (TB, M*H) intermediates small; multiple of 8 (sublanes).
            block_b = min(128, max(8, ((B // 2) + 7) // 8 * 8))
        else:
            block_b = B
    if block_b != B:
        assert block_b % 8 == 0, (
            "block_b must be a multiple of 8 (sublane constraint) unless it equals B")
    grid_b = pl.cdiv(B, block_b)
    # Note: if B % block_b != 0, padded rows in the last tile flow through LN/rsqrt;
    # their outputs are masked on write-back and discarded.

    x32 = x.astype(jnp.float32)

    def _estimate_vmem(weight_buffers):
        nbuf = 2 if weight_buffers is None else weight_buffers
        w1_bytes = H * M * H * jnp.dtype(w1_all.dtype).itemsize
        small_w_bytes = (M * H + 2 * H + M * H + M) * 4
        weight_bytes = nbuf * (w1_bytes + small_w_bytes)
        io_bytes = 2 * 2 * (block_b * H * 4 + block_b * M * 4)   # x/out, double-buffered
        temp_bytes = 4 * block_b * M * H * 4                      # y_all + per-head temps
        est = int(1.5 * (weight_bytes + io_bytes + temp_bytes))
        return min(64 * 1024 * 1024, max(32 * 1024 * 1024, est))

    def _run(weight_buffers):
        def _const_spec(shape):
            if weight_buffers is None:
                return pl.BlockSpec(shape, lambda i: (0, 0))
            return pl.BlockSpec(shape, lambda i: (0, 0),
                                pipeline_mode=pl.Buffered(weight_buffers))

        call = pl.pallas_call(
            _rate_embedding_kernel,
            out_shape=jax.ShapeDtypeStruct((B, M), jnp.float32),
            grid=(grid_b,),
            in_specs=[
                pl.BlockSpec((block_b, H), lambda i: (i, 0)),   # x, batch-tiled
                _const_spec((H, M * H)),                        # stacked W1^T
                _const_spec((1, M * H)),                        # stacked b1
                _const_spec((1, H)),                            # shared LN gamma
                _const_spec((1, H)),                            # shared LN beta
                _const_spec((M, H)),                            # W2 rows (f32)
                _const_spec((1, M)),                            # b2
            ],
            out_specs=pl.BlockSpec((block_b, M), lambda i: (i, 0)),
            compiler_params=pltpu.CompilerParams(
                dimension_semantics=("parallel",),
                vmem_limit_bytes=_estimate_vmem(weight_buffers)),
        )
        return call(x32, w1_all, b1_all, gamma2, beta2, w2_all, b2_all)

    try:
        # Single-buffer the grid-invariant weights (halves their VMEM footprint).
        out = _run(1)
    except Exception:
        # Fallback if pl.Buffered / pipeline_mode is unsupported on this jax version.
        out = _run(None)

    # Match the PyTorch forward: list of M tensors (B, 1), stacked as (M, B, 1).
    return jnp.transpose(out, (1, 0))[:, :, None]


def reference(x, w1, b1, gamma, beta, w2, b2):
    outs = []
    g = gamma.reshape(1, -1)
    be = beta.reshape(1, -1)
    for m in range(w1.shape[0]):
        y = x @ w1[m].T + b1[m][None, :] + x
        mean = jnp.mean(y, axis=-1, keepdims=True)
        var = jnp.mean((y - mean) ** 2, axis=-1, keepdims=True)
        ln = (y - mean) / jnp.sqrt(var + LN_EPS) * g + be
        h = jnp.maximum(ln, 0.0)
        o = jax.nn.sigmoid(h @ w2[m][:, None] + b2[m, 0])
        outs.append(o)
    return jnp.stack(outs, axis=0)


if __name__ == "__main__":
    B, H, M = 8, 128, 3   # batch, hidden_dim, number of metric heads

    key = jax.random.PRNGKey(0)
    k = jax.random.split(key, 7)
    x = jax.random.normal(k[0], (B, H), jnp.float32)
    w1 = jax.random.normal(k[1], (M, H, H), jnp.float32) * 0.02
    b1 = jax.random.normal(k[2], (M, H), jnp.float32) * 0.02
    gamma = 1.0 + 0.1 * jax.random.normal(k[3], (1, H), jnp.float32)
    beta = 0.1 * jax.random.normal(k[4], (1, H), jnp.float32)
    w2 = jax.random.normal(k[5], (M, H), jnp.float32) * 0.02
    b2 = jax.random.normal(k[6], (M, 1), jnp.float32) * 0.02

    ref = reference(x, w1, b1, gamma, beta, w2, b2)

    # f32-weight path: tight tolerance against the reference.
    packed_f32 = pack_rate_embedding_params(w1, b1, gamma, beta, w2, b2,
                                            w1_dtype=jnp.float32)
    packed_f32 = jax.block_until_ready(packed_f32)
    out_f32 = jax.block_until_ready(rate_embedding(x, packed_f32))
    np.testing.assert_allclose(np.asarray(out_f32), np.asarray(ref),
                               rtol=1e-4, atol=1e-4)

    # Default serving path: bf16 W1 (half the dominant weight DMA), looser tolerance.
    packed_bf16 = pack_rate_embedding_params(w1, b1, gamma, beta, w2, b2)
    packed_bf16 = jax.block_until_ready(packed_bf16)
    out_bf16 = jax.block_until_ready(rate_embedding(x, packed_bf16))
    np.testing.assert_allclose(np.asarray(out_bf16), np.asarray(ref),
                               rtol=3e-2, atol=3e-2)

    print("KERNEL_OK")
</pallas_src>

<mosaic_0001>
module attributes {stable_mosaic.version = 11 : i64} {
  func.func @_rate_embedding_kernel(%arg0: i32, %arg1: memref<8x128xf32, #tpu.memory_space<vmem>>, %arg2: memref<128x384xf32, #tpu.memory_space<vmem>>, %arg3: memref<1x384xf32, #tpu.memory_space<vmem>>, %arg4: memref<1x128xf32, #tpu.memory_space<vmem>>, %arg5: memref<1x128xf32, #tpu.memory_space<vmem>>, %arg6: memref<3x128xf32, #tpu.memory_space<vmem>>, %arg7: memref<1x3xf32, #tpu.memory_space<vmem>>, %arg8: memref<8x3xf32, #tpu.memory_space<vmem>>) attributes {dimension_semantics = [#tpu.dimension_semantics<parallel>], iteration_bounds = array<i64: 1>, scalar_prefetch = 0 : i64, scratch_operands = 0 : i64, tpu.core_type = #tpu.core_type<tc>, window_params = [{transform_indices = @transform_0, window_bounds = array<i64: 8, 128>}, {pipeline_mode = #tpu.pipeline_mode<synchronous>, transform_indices = @transform_1, window_bounds = array<i64: 128, 384>}, {pipeline_mode = #tpu.pipeline_mode<synchronous>, transform_indices = @transform_2, window_bounds = array<i64: 1, 384>}, {pipeline_mode = #tpu.pipeline_mode<synchronous>, transform_indices = @transform_3, window_bounds = array<i64: 1, 128>}, {pipeline_mode = #tpu.pipeline_mode<synchronous>, transform_indices = @transform_4, window_bounds = array<i64: 1, 128>}, {pipeline_mode = #tpu.pipeline_mode<synchronous>, transform_indices = @transform_5, window_bounds = array<i64: 3, 128>}, {pipeline_mode = #tpu.pipeline_mode<synchronous>, transform_indices = @transform_6, window_bounds = array<i64: 1, 3>}, {transform_indices = @transform_7, window_bounds = array<i64: 8, 3>}]} {
    %c0 = arith.constant 0 : index
    %c0_0 = arith.constant 0 : index
    %0 = vector.load %arg1[%c0, %c0_0] : memref<8x128xf32, #tpu.memory_space<vmem>>, vector<8x128xf32>
    %c0_1 = arith.constant 0 : index
    %c0_2 = arith.constant 0 : index
    %1 = vector.load %arg2[%c0_1, %c0_2] : memref<128x384xf32, #tpu.memory_space<vmem>>, vector<128x384xf32>
    %cst = arith.constant dense<0.000000e+00> : vector<8x384xf32>
    %2 = tpu.matmul %0, %1, %cst {dimension_numbers = #tpu.dot_dimension_numbers<[1], [0], [0], [1], [0, 0, 1, 1], [], []>} : vector<8x128xf32>, vector<128x384xf32>, vector<8x384xf32> -> vector<8x384xf32>
    %c0_3 = arith.constant 0 : index
    %c0_4 = arith.constant 0 : index
    %3 = vector.load %arg3[%c0_3, %c0_4] : memref<1x384xf32, #tpu.memory_space<vmem>>, vector<1x384xf32>
    %4 = vector.broadcast %3 : vector<1x384xf32> to vector<8x384xf32>
    %5 = arith.addf %2, %4 : vector<8x384xf32>
    %c0_5 = arith.constant 0 : index
    %c0_6 = arith.constant 0 : index
    %6 = vector.load %arg4[%c0_5, %c0_6] : memref<1x128xf32, #tpu.memory_space<vmem>>, vector<1x128xf32>
    %c0_7 = arith.constant 0 : index
    %c0_8 = arith.constant 0 : index
    %7 = vector.load %arg5[%c0_7, %c0_8] : memref<1x128xf32, #tpu.memory_space<vmem>>, vector<1x128xf32>
    %c0_9 = arith.constant 0 : index
    %c0_10 = arith.constant 0 : index
    %8 = vector.load %arg6[%c0_9, %c0_10] : memref<3x128xf32, #tpu.memory_space<vmem>>, vector<3x128xf32>
    %9 = vector.extract_strided_slice %5 {offsets = [0, 0], sizes = [8, 128], strides = [1, 1]} : vector<8x384xf32> to vector<8x128xf32>
    %10 = arith.addf %9, %0 : vector<8x128xf32>
    %cst_11 = arith.constant dense<0.000000e+00> : vector<8xf32>
    %11 = vector.multi_reduction <add>, %10, %cst_11 [1] : vector<8x128xf32> to vector<8xf32>
    %12 = vector.shape_cast %11 : vector<8xf32> to vector<8x1xf32>
    %13 = arith.mulf %10, %10 : vector<8x128xf32>
    %cst_12 = arith.constant dense<0.000000e+00> : vector<8xf32>
    %14 = vector.multi_reduction <add>, %13, %cst_12 [1] : vector<8x128xf32> to vector<8xf32>
    %15 = vector.shape_cast %14 : vector<8xf32> to vector<8x1xf32>
    %cst_13 = arith.constant 7.812500e-03 : f32
    %16 = vector.broadcast %cst_13 : f32 to vector<8x1xf32>
    %17 = arith.mulf %12, %16 : vector<8x1xf32>
    %cst_14 = arith.constant 7.812500e-03 : f32
    %18 = vector.broadcast %cst_14 : f32 to vector<8x1xf32>
    %19 = arith.mulf %15, %18 : vector<8x1xf32>
    %20 = arith.mulf %17, %17 : vector<8x1xf32>
    %21 = arith.subf %19, %20 : vector<8x1xf32>
    %22 = vector.broadcast %17 : vector<8x1xf32> to vector<8x128xf32>
    %23 = arith.subf %10, %22 : vector<8x128xf32>
    %cst_15 = arith.constant 9.99999974E-6 : f32
    %24 = vector.broadcast %cst_15 : f32 to vector<8x1xf32>
    %25 = arith.addf %21, %24 : vector<8x1xf32>
    %26 = math.rsqrt %25 : vector<8x1xf32>
    %27 = vector.broadcast %26 : vector<8x1xf32> to vector<8x128xf32>
    %28 = arith.mulf %23, %27 : vector<8x128xf32>
    %29 = vector.broadcast %6 : vector<1x128xf32> to vector<8x128xf32>
    %30 = arith.mulf %28, %29 : vector<8x128xf32>
    %31 = vector.broadcast %7 : vector<1x128xf32> to vector<8x128xf32>
    %32 = arith.addf %30, %31 : vector<8x128xf32>
    %cst_16 = arith.constant 0.000000e+00 : f32
    %33 = vector.broadcast %cst_16 : f32 to vector<8x128xf32>
    %34 = arith.maximumf %32, %33 : vector<8x128xf32>
    %35 = vector.extract_strided_slice %8 {offsets = [0, 0], sizes = [1, 128], strides = [1, 1]} : vector<3x128xf32> to vector<1x128xf32>
    %36 = vector.broadcast %35 : vector<1x128xf32> to vector<8x128xf32>
    %37 = arith.mulf %34, %36 : vector<8x128xf32>
    %cst_17 = arith.constant dense<0.000000e+00> : vector<8xf32>
    %38 = vector.multi_reduction <add>, %37, %cst_17 [1] : vector<8x128xf32> to vector<8xf32>
    %39 = vector.shape_cast %38 : vector<8xf32> to vector<8x1xf32>
    %40 = vector.extract_strided_slice %5 {offsets = [0, 128], sizes = [8, 128], strides = [1, 1]} : vector<8x384xf32> to vector<8x128xf32>
    %41 = arith.addf %40, %0 : vector<8x128xf32>
    %cst_18 = arith.constant dense<0.000000e+00> : vector<8xf32>
    %42 = vector.multi_reduction <add>, %41, %cst_18 [1] : vector<8x128xf32> to vector<8xf32>
    %43 = vector.shape_cast %42 : vector<8xf32> to vector<8x1xf32>
    %44 = arith.mulf %41, %41 : vector<8x128xf32>
    %cst_19 = arith.constant dense<0.000000e+00> : vector<8xf32>
    %45 = vector.multi_reduction <add>, %44, %cst_19 [1] : vector<8x128xf32> to vector<8xf32>
    %46 = vector.shape_cast %45 : vector<8xf32> to vector<8x1xf32>
    %cst_20 = arith.constant 7.812500e-03 : f32
    %47 = vector.broadcast %cst_20 : f32 to vector<8x1xf32>
    %48 = arith.mulf %43, %47 : vector<8x1xf32>
    %cst_21 = arith.constant 7.812500e-03 : f32
    %49 = vector.broadcast %cst_21 : f32 to vector<8x1xf32>
    %50 = arith.mulf %46, %49 : vector<8x1xf32>
    %51 = arith.mulf %48, %48 : vector<8x1xf32>
    %52 = arith.subf %50, %51 : vector<8x1xf32>
    %53 = vector.broadcast %48 : vector<8x1xf32> to vector<8x128xf32>
    %54 = arith.subf %41, %53 : vector<8x128xf32>
    %cst_22 = arith.constant 9.99999974E-6 : f32
    %55 = vector.broadcast %cst_22 : f32 to vector<8x1xf32>
    %56 = arith.addf %52, %55 : vector<8x1xf32>
    %57 = math.rsqrt %56 : vector<8x1xf32>
    %58 = vector.broadcast %57 : vector<8x1xf32> to vector<8x128xf32>
    %59 = arith.mulf %54, %58 : vector<8x128xf32>
    %60 = vector.broadcast %6 : vector<1x128xf32> to vector<8x128xf32>
    %61 = arith.mulf %59, %60 : vector<8x128xf32>
    %62 = vector.broadcast %7 : vector<1x128xf32> to vector<8x128xf32>
    %63 = arith.addf %61, %62 : vector<8x128xf32>
    %cst_23 = arith.constant 0.000000e+00 : f32
    %64 = vector.broadcast %cst_23 : f32 to vector<8x128xf32>
    %65 = arith.maximumf %63, %64 : vector<8x128xf32>
    %66 = vector.extract_strided_slice %8 {offsets = [1, 0], sizes = [1, 128], strides = [1, 1]} : vector<3x128xf32> to vector<1x128xf32>
    %67 = vector.broadcast %66 : vector<1x128xf32> to vector<8x128xf32>
    %68 = arith.mulf %65, %67 : vector<8x128xf32>
    %cst_24 = arith.constant dense<0.000000e+00> : vector<8xf32>
    %69 = vector.multi_reduction <add>, %68, %cst_24 [1] : vector<8x128xf32> to vector<8xf32>
    %70 = vector.shape_cast %69 : vector<8xf32> to vector<8x1xf32>
    %71 = vector.extract_strided_slice %5 {offsets = [0, 256], sizes = [8, 128], strides = [1, 1]} : vector<8x384xf32> to vector<8x128xf32>
    %72 = arith.addf %71, %0 : vector<8x128xf32>
    %cst_25 = arith.constant dense<0.000000e+00> : vector<8xf32>
    %73 = vector.multi_reduction <add>, %72, %cst_25 [1] : vector<8x128xf32> to vector<8xf32>
    %74 = vector.shape_cast %73 : vector<8xf32> to vector<8x1xf32>
    %75 = arith.mulf %72, %72 : vector<8x128xf32>
    %cst_26 = arith.constant dense<0.000000e+00> : vector<8xf32>
    %76 = vector.multi_reduction <add>, %75, %cst_26 [1] : vector<8x128xf32> to vector<8xf32>
    %77 = vector.shape_cast %76 : vector<8xf32> to vector<8x1xf32>
    %cst_27 = arith.constant 7.812500e-03 : f32
    %78 = vector.broadcast %cst_27 : f32 to vector<8x1xf32>
    %79 = arith.mulf %74, %78 : vector<8x1xf32>
    %cst_28 = arith.constant 7.812500e-03 : f32
    %80 = vector.broadcast %cst_28 : f32 to vector<8x1xf32>
    %81 = arith.mulf %77, %80 : vector<8x1xf32>
    %82 = arith.mulf %79, %79 : vector<8x1xf32>
    %83 = arith.subf %81, %82 : vector<8x1xf32>
    %84 = vector.broadcast %79 : vector<8x1xf32> to vector<8x128xf32>
    %85 = arith.subf %72, %84 : vector<8x128xf32>
    %cst_29 = arith.constant 9.99999974E-6 : f32
    %86 = vector.broadcast %cst_29 : f32 to vector<8x1xf32>
    %87 = arith.addf %83, %86 : vector<8x1xf32>
    %88 = math.rsqrt %87 : vector<8x1xf32>
    %89 = vector.broadcast %88 : vector<8x1xf32> to vector<8x128xf32>
    %90 = arith.mulf %85, %89 : vector<8x128xf32>
    %91 = vector.broadcast %6 : vector<1x128xf32> to vector<8x128xf32>
    %92 = arith.mulf %90, %91 : vector<8x128xf32>
    %93 = vector.broadcast %7 : vector<1x128xf32> to vector<8x128xf32>
    %94 = arith.addf %92, %93 : vector<8x128xf32>
    %cst_30 = arith.constant 0.000000e+00 : f32
    %95 = vector.broadcast %cst_30 : f32 to vector<8x128xf32>
    %96 = arith.maximumf %94, %95 : vector<8x128xf32>
    %97 = vector.extract_strided_slice %8 {offsets = [2, 0], sizes = [1, 128], strides = [1, 1]} : vector<3x128xf32> to vector<1x128xf32>
    %98 = vector.broadcast %97 : vector<1x128xf32> to vector<8x128xf32>
    %99 = arith.mulf %96, %98 : vector<8x128xf32>
    %cst_31 = arith.constant dense<0.000000e+00> : vector<8xf32>
    %100 = vector.multi_reduction <add>, %99, %cst_31 [1] : vector<8x128xf32> to vector<8xf32>
    %101 = vector.shape_cast %100 : vector<8xf32> to vector<8x1xf32>
    %102 = tpu.concatenate %39, %70, %101 in 1 : vector<8x1xf32>, vector<8x1xf32>, vector<8x1xf32> -> vector<8x3xf32>
    %c0_32 = arith.constant 0 : index
    %c0_33 = arith.constant 0 : index
    %103 = vector.load %arg7[%c0_32, %c0_33] : memref<1x3xf32, #tpu.memory_space<vmem>>, vector<1x3xf32>
    %104 = vector.broadcast %103 : vector<1x3xf32> to vector<8x3xf32>
    %105 = arith.addf %102, %104 : vector<8x3xf32>
    %106 = arith.negf %105 : vector<8x3xf32>
    %107 = math.exp %106 : vector<8x3xf32>
    %cst_34 = arith.constant 1.000000e+00 : f32
    %108 = vector.broadcast %cst_34 : f32 to vector<8x3xf32>
    %109 = arith.addf %108, %107 : vector<8x3xf32>
    %110 = arith.divf %108, %109 : vector<8x3xf32>
    %c0_35 = arith.constant 0 : index
    %c0_36 = arith.constant 0 : index
    %111 = vector.load %arg8[%c0_35, %c0_36] : memref<8x3xf32, #tpu.memory_space<vmem>>, vector<8x3xf32>
    tpu.vector_store %arg8[%c0_35, %c0_36], %110 {strides = array<i32>} : memref<8x3xf32, #tpu.memory_space<vmem>>, vector<8x3xf32>,
    return
  }
  func.func @transform_0(%arg0: i32) -> (i32, i32) {
    %c0_i32 = arith.constant 0 : i32
    %c0_i32_0 = arith.constant 0 : i32
    return %arg0, %c0_i32 : i32, i32
  }
  func.func @transform_1(%arg0: i32) -> (i32, i32) {
    %c0_i32 = arith.constant 0 : i32
    %c0_i32_0 = arith.constant 0 : i32
    %c0_i32_1 = arith.constant 0 : i32
    return %c0_i32, %c0_i32_0 : i32, i32
  }
  func.func @transform_2(%arg0: i32) -> (i32, i32) {
    %c0_i32 = arith.constant 0 : i32
    %c0_i32_0 = arith.constant 0 : i32
    %c0_i32_1 = arith.constant 0 : i32
    return %c0_i32, %c0_i32_0 : i32, i32
  }
  func.func @transform_3(%arg0: i32) -> (i32, i32) {
    %c0_i32 = arith.constant 0 : i32
    %c0_i32_0 = arith.constant 0 : i32
    %c0_i32_1 = arith.constant 0 : i32
    return %c0_i32, %c0_i32_0 : i32, i32
  }
  func.func @transform_4(%arg0: i32) -> (i32, i32) {
    %c0_i32 = arith.constant 0 : i32
    %c0_i32_0 = arith.constant 0 : i32
    %c0_i32_1 = arith.constant 0 : i32
    return %c0_i32, %c0_i32_0 : i32, i32
  }
  func.func @transform_5(%arg0: i32) -> (i32, i32) {
    %c0_i32 = arith.constant 0 : i32
    %c0_i32_0 = arith.constant 0 : i32
    %c0_i32_1 = arith.constant 0 : i32
    return %c0_i32, %c0_i32_0 : i32, i32
  }
  func.func @transform_6(%arg0: i32) -> (i32, i32) {
    %c0_i32 = arith.constant 0 : i32
    %c0_i32_0 = arith.constant 0 : i32
    %c0_i32_1 = arith.constant 0 : i32
    return %c0_i32, %c0_i32_0 : i32, i32
  }
  func.func @transform_7(%arg0: i32) -> (i32, i32) {
    %c0_i32 = arith.constant 0 : i32
    %c0_i32_0 = arith.constant 0 : i32
    return %arg0, %c0_i32 : i32, i32
  }
}

module attributes {stable_mosaic.version = 11 : i64} {
  func.func @_rate_embedding_kernel(%arg0: i32, %arg1: memref<8x128xf32, #tpu.memory_space<vmem>>, %arg2: memref<128x384xf32, #tpu.memory_space<vmem>>, %arg3: memref<1x384xf32, #tpu.memory_space<vmem>>, %arg4: memref<1x128xf32, #tpu.memory_space<vmem>>, %arg5: memref<1x128xf32, #tpu.memory_space<vmem>>, %arg6: memref<3x128xf32, #tpu.memory_space<vmem>>, %arg7: memref<1x3xf32, #tpu.memory_space<vmem>>, %arg8: memref<8x3xf32, #tpu.memory_space<vmem>>) attributes {dimension_semantics = [#tpu.dimension_semantics<parallel>], iteration_bounds = array<i64: 1>, scalar_prefetch = 0 : i64, scratch_operands = 0 : i64, tpu.core_type = #tpu.core_type<tc>, window_params = [{transform_indices = @transform_0, window_bounds = array<i64: 8, 128>}, {pipeline_mode = #tpu.pipeline_mode<synchronous>, transform_indices = @transform_1, window_bounds = array<i64: 128, 384>}, {pipeline_mode = #tpu.pipeline_mode<synchronous>, transform_indices = @transform_2, window_bounds = array<i64: 1, 384>}, {pipeline_mode = #tpu.pipeline_mode<synchronous>, transform_indices = @transform_3, window_bounds = array<i64: 1, 128>}, {pipeline_mode = #tpu.pipeline_mode<synchronous>, transform_indices = @transform_4, window_bounds = array<i64: 1, 128>}, {pipeline_mode = #tpu.pipeline_mode<synchronous>, transform_indices = @transform_5, window_bounds = array<i64: 3, 128>}, {pipeline_mode = #tpu.pipeline_mode<synchronous>, transform_indices = @transform_6, window_bounds = array<i64: 1, 3>}, {transform_indices = @transform_7, window_bounds = array<i64: 8, 3>}]} {
    %c0 = arith.constant 0 : index
    %c0_0 = arith.constant 0 : index
    %0 = vector.load %arg1[%c0, %c0_0] : memref<8x128xf32, #tpu.memory_space<vmem>>, vector<8x128xf32>
    %c0_1 = arith.constant 0 : index
    %c0_2 = arith.constant 0 : index
    %1 = vector.load %arg2[%c0_1, %c0_2] : memref<128x384xf32, #tpu.memory_space<vmem>>, vector<128x384xf32>
    %cst = arith.constant dense<0.000000e+00> : vector<8x384xf32>
    %2 = tpu.matmul %0, %1, %cst {dimension_numbers = #tpu.dot_dimension_numbers<[1], [0], [0], [1], [0, 0, 1, 1], [], []>} : vector<8x128xf32>, vector<128x384xf32>, vector<8x384xf32> -> vector<8x384xf32>
    %c0_3 = arith.constant 0 : index
    %c0_4 = arith.constant 0 : index
    %3 = vector.load %arg3[%c0_3, %c0_4] : memref<1x384xf32, #tpu.memory_space<vmem>>, vector<1x384xf32>
    %4 = vector.broadcast %3 : vector<1x384xf32> to vector<8x384xf32>
    %5 = arith.addf %2, %4 : vector<8x384xf32>
    %c0_5 = arith.constant 0 : index
    %c0_6 = arith.constant 0 : index
    %6 = vector.load %arg4[%c0_5, %c0_6] : memref<1x128xf32, #tpu.memory_space<vmem>>, vector<1x128xf32>
    %c0_7 = arith.constant 0 : index
    %c0_8 = arith.constant 0 : index
    %7 = vector.load %arg5[%c0_7, %c0_8] : memref<1x128xf32, #tpu.memory_space<vmem>>, vector<1x128xf32>
    %c0_9 = arith.constant 0 : index
    %c0_10 = arith.constant 0 : index
    %8 = vector.load %arg6[%c0_9, %c0_10] : memref<3x128xf32, #tpu.memory_space<vmem>>, vector<3x128xf32>
    %9 = vector.extract_strided_slice %5 {offsets = [0, 0], sizes = [8, 128], strides = [1, 1]} : vector<8x384xf32> to vector<8x128xf32>
    %10 = arith.addf %9, %0 : vector<8x128xf32>
    %cst_11 = arith.constant dense<0.000000e+00> : vector<8xf32>
    %11 = vector.multi_reduction <add>, %10, %cst_11 [1] : vector<8x128xf32> to vector<8xf32>
    %12 = vector.shape_cast %11 : vector<8xf32> to vector<8x1xf32>
    %13 = arith.mulf %10, %10 : vector<8x128xf32>
    %cst_12 = arith.constant dense<0.000000e+00> : vector<8xf32>
    %14 = vector.multi_reduction <add>, %13, %cst_12 [1] : vector<8x128xf32> to vector<8xf32>
    %15 = vector.shape_cast %14 : vector<8xf32> to vector<8x1xf32>
    %cst_13 = arith.constant 7.812500e-03 : f32
    %16 = vector.broadcast %cst_13 : f32 to vector<8x1xf32>
    %17 = arith.mulf %12, %16 : vector<8x1xf32>
    %cst_14 = arith.constant 7.812500e-03 : f32
    %18 = vector.broadcast %cst_14 : f32 to vector<8x1xf32>
    %19 = arith.mulf %15, %18 : vector<8x1xf32>
    %20 = arith.mulf %17, %17 : vector<8x1xf32>
    %21 = arith.subf %19, %20 : vector<8x1xf32>
    %22 = vector.broadcast %17 : vector<8x1xf32> to vector<8x128xf32>
    %23 = arith.subf %10, %22 : vector<8x128xf32>
    %cst_15 = arith.constant 9.99999974E-6 : f32
    %24 = vector.broadcast %cst_15 : f32 to vector<8x1xf32>
    %25 = arith.addf %21, %24 : vector<8x1xf32>
    %26 = math.rsqrt %25 : vector<8x1xf32>
    %27 = vector.broadcast %26 : vector<8x1xf32> to vector<8x128xf32>
    %28 = arith.mulf %23, %27 : vector<8x128xf32>
    %29 = vector.broadcast %6 : vector<1x128xf32> to vector<8x128xf32>
    %30 = arith.mulf %28, %29 : vector<8x128xf32>
    %31 = vector.broadcast %7 : vector<1x128xf32> to vector<8x128xf32>
    %32 = arith.addf %30, %31 : vector<8x128xf32>
    %cst_16 = arith.constant 0.000000e+00 : f32
    %33 = vector.broadcast %cst_16 : f32 to vector<8x128xf32>
    %34 = arith.maximumf %32, %33 : vector<8x128xf32>
    %35 = vector.extract_strided_slice %8 {offsets = [0, 0], sizes = [1, 128], strides = [1, 1]} : vector<3x128xf32> to vector<1x128xf32>
    %36 = vector.broadcast %35 : vector<1x128xf32> to vector<8x128xf32>
    %37 = arith.mulf %34, %36 : vector<8x128xf32>
    %cst_17 = arith.constant dense<0.000000e+00> : vector<8xf32>
    %38 = vector.multi_reduction <add>, %37, %cst_17 [1] : vector<8x128xf32> to vector<8xf32>
    %39 = vector.shape_cast %38 : vector<8xf32> to vector<8x1xf32>
    %40 = vector.extract_strided_slice %5 {offsets = [0, 128], sizes = [8, 128], strides = [1, 1]} : vector<8x384xf32> to vector<8x128xf32>
    %41 = arith.addf %40, %0 : vector<8x128xf32>
    %cst_18 = arith.constant dense<0.000000e+00> : vector<8xf32>
    %42 = vector.multi_reduction <add>, %41, %cst_18 [1] : vector<8x128xf32> to vector<8xf32>
    %43 = vector.shape_cast %42 : vector<8xf32> to vector<8x1xf32>
    %44 = arith.mulf %41, %41 : vector<8x128xf32>
    %cst_19 = arith.constant dense<0.000000e+00> : vector<8xf32>
    %45 = vector.multi_reduction <add>, %44, %cst_19 [1] : vector<8x128xf32> to vector<8xf32>
    %46 = vector.shape_cast %45 : vector<8xf32> to vector<8x1xf32>
    %cst_20 = arith.constant 7.812500e-03 : f32
    %47 = vector.broadcast %cst_20 : f32 to vector<8x1xf32>
    %48 = arith.mulf %43, %47 : vector<8x1xf32>
    %cst_21 = arith.constant 7.812500e-03 : f32
    %49 = vector.broadcast %cst_21 : f32 to vector<8x1xf32>
    %50 = arith.mulf %46, %49 : vector<8x1xf32>
    %51 = arith.mulf %48, %48 : vector<8x1xf32>
    %52 = arith.subf %50, %51 : vector<8x1xf32>
    %53 = vector.broadcast %48 : vector<8x1xf32> to vector<8x128xf32>
    %54 = arith.subf %41, %53 : vector<8x128xf32>
    %cst_22 = arith.constant 9.99999974E-6 : f32
    %55 = vector.broadcast %cst_22 : f32 to vector<8x1xf32>
    %56 = arith.addf %52, %55 : vector<8x1xf32>
    %57 = math.rsqrt %56 : vector<8x1xf32>
    %58 = vector.broadcast %57 : vector<8x1xf32> to vector<8x128xf32>
    %59 = arith.mulf %54, %58 : vector<8x128xf32>
    %60 = vector.broadcast %6 : vector<1x128xf32> to vector<8x128xf32>
    %61 = arith.mulf %59, %60 : vector<8x128xf32>
    %62 = vector.broadcast %7 : vector<1x128xf32> to vector<8x128xf32>
    %63 = arith.addf %61, %62 : vector<8x128xf32>
    %cst_23 = arith.constant 0.000000e+00 : f32
    %64 = vector.broadcast %cst_23 : f32 to vector<8x128xf32>
    %65 = arith.maximumf %63, %64 : vector<8x128xf32>
    %66 = vector.extract_strided_slice %8 {offsets = [1, 0], sizes = [1, 128], strides = [1, 1]} : vector<3x128xf32> to vector<1x128xf32>
    %67 = vector.broadcast %66 : vector<1x128xf32> to vector<8x128xf32>
    %68 = arith.mulf %65, %67 : vector<8x128xf32>
    %cst_24 = arith.constant dense<0.000000e+00> : vector<8xf32>
    %69 = vector.multi_reduction <add>, %68, %cst_24 [1] : vector<8x128xf32> to vector<8xf32>
    %70 = vector.shape_cast %69 : vector<8xf32> to vector<8x1xf32>
    %71 = vector.extract_strided_slice %5 {offsets = [0, 256], sizes = [8, 128], strides = [1, 1]} : vector<8x384xf32> to vector<8x128xf32>
    %72 = arith.addf %71, %0 : vector<8x128xf32>
    %cst_25 = arith.constant dense<0.000000e+00> : vector<8xf32>
    %73 = vector.multi_reduction <add>, %72, %cst_25 [1] : vector<8x128xf32> to vector<8xf32>
    %74 = vector.shape_cast %73 : vector<8xf32> to vector<8x1xf32>
    %75 = arith.mulf %72, %72 : vector<8x128xf32>
    %cst_26 = arith.constant dense<0.000000e+00> : vector<8xf32>
    %76 = vector.multi_reduction <add>, %75, %cst_26 [1] : vector<8x128xf32> to vector<8xf32>
    %77 = vector.shape_cast %76 : vector<8xf32> to vector<8x1xf32>
    %cst_27 = arith.constant 7.812500e-03 : f32
    %78 = vector.broadcast %cst_27 : f32 to vector<8x1xf32>
    %79 = arith.mulf %74, %78 : vector<8x1xf32>
    %cst_28 = arith.constant 7.812500e-03 : f32
    %80 = vector.broadcast %cst_28 : f32 to vector<8x1xf32>
    %81 = arith.mulf %77, %80 : vector<8x1xf32>
    %82 = arith.mulf %79, %79 : vector<8x1xf32>
    %83 = arith.subf %81, %82 : vector<8x1xf32>
    %84 = vector.broadcast %79 : vector<8x1xf32> to vector<8x128xf32>
    %85 = arith.subf %72, %84 : vector<8x128xf32>
    %cst_29 = arith.constant 9.99999974E-6 : f32
    %86 = vector.broadcast %cst_29 : f32 to vector<8x1xf32>
    %87 = arith.addf %83, %86 : vector<8x1xf32>
    %88 = math.rsqrt %87 : vector<8x1xf32>
    %89 = vector.broadcast %88 : vector<8x1xf32> to vector<8x128xf32>
    %90 = arith.mulf %85, %89 : vector<8x128xf32>
    %91 = vector.broadcast %6 : vector<1x128xf32> to vector<8x128xf32>
    %92 = arith.mulf %90, %91 : vector<8x128xf32>
    %93 = vector.broadcast %7 : vector<1x128xf32> to vector<8x128xf32>
    %94 = arith.addf %92, %93 : vector<8x128xf32>
    %cst_30 = arith.constant 0.000000e+00 : f32
    %95 = vector.broadcast %cst_30 : f32 to vector<8x128xf32>
    %96 = arith.maximumf %94, %95 : vector<8x128xf32>
    %97 = vector.extract_strided_slice %8 {offsets = [2, 0], sizes = [1, 128], strides = [1, 1]} : vector<3x128xf32> to vector<1x128xf32>
    %98 = vector.broadcast %97 : vector<1x128xf32> to vector<8x128xf32>
    %99 = arith.mulf %96, %98 : vector<8x128xf32>
    %cst_31 = arith.constant dense<0.000000e+00> : vector<8xf32>
    %100 = vector.multi_reduction <add>, %99, %cst_31 [1] : vector<8x128xf32> to vector<8xf32>
    %101 = vector.shape_cast %100 : vector<8xf32> to vector<8x1xf32>
    %102 = tpu.concatenate %39, %70, %101 in 1 : vector<8x1xf32>, vector<8x1xf32>, vector<8x1xf32> -> vector<8x3xf32>
    %c0_32 = arith.constant 0 : index
    %c0_33 = arith.constant 0 : index
    %103 = vector.load %arg7[%c0_32, %c0_33] : memref<1x3xf32, #tpu.memory_space<vmem>>, vector<1x3xf32>
    %104 = vector.broadcast %103 : vector<1x3xf32> to vector<8x3xf32>
    %105 = arith.addf %102, %104 : vector<8x3xf32>
    %106 = arith.negf %105 : vector<8x3xf32>
    %107 = math.exp %106 : vector<8x3xf32>
    %cst_34 = arith.constant 1.000000e+00 : f32
    %108 = vector.broadcast %cst_34 : f32 to vector<8x3xf32>
    %109 = arith.addf %108, %107 : vector<8x3xf32>
    %110 = arith.divf %108, %109 : vector<8x3xf32>
    %c0_35 = arith.constant 0 : index
    %c0_36 = arith.constant 0 : index
    %111 = vector.load %arg8[%c0_35, %c0_36] : memref<8x3xf32, #tpu.memory_space<vmem>>, vector<8x3xf32>
    tpu.vector_store %arg8[%c0_35, %c0_36], %110 {strides = array<i32>} : memref<8x3xf32, #tpu.memory_space<vmem>>, vector<8x3xf32>,
    return
  }
  func.func @transform_0(%arg0: i32) -> (i32, i32) {
    %c0_i32 = arith.constant 0 : i32
    %c0_i32_0 = arith.constant 0 : i32
    return %arg0, %c0_i32 : i32, i32
  }
  func.func @transform_1(%arg0: i32) -> (i32, i32) {
    %c0_i32 = arith.constant 0 : i32
    %c0_i32_0 = arith.constant 0 : i32
    %c0_i32_1 = arith.constant 0 : i32
    return %c0_i32, %c0_i32_0 : i32, i32
  }
  func.func @transform_2(%arg0: i32) -> (i32, i32) {
    %c0_i32 = arith.constant 0 : i32
    %c0_i32_0 = arith.constant 0 : i32
    %c0_i32_1 = arith.constant 0 : i32
    return %c0_i32, %c0_i32_0 : i32, i32
  }
  func.func @transform_3(%arg0: i32) -> (i32, i32) {
    %c0_i32 = arith.constant 0 : i32
    %c0_i32_0 = arith.constant 0 : i32
    %c0_i32_1 = arith.constant 0 : i32
    return %c0_i32, %c0_i32_0 : i32, i32
  }
  func.func @transform_4(%arg0: i32) -> (i32, i32) {
    %c0_i32 = arith.constant 0 : i32
    %c0_i32_0 = arith.constant 0 : i32
    %c0_i32_1 = arith.constant 0 : i32
    return %c0_i32, %c0_i32_0 : i32, i32
  }
  func.func @transform_5(%arg0: i32) -> (i32, i32) {
    %c0_i32 = arith.constant 0 : i32
    %c0_i32_0 = arith.constant 0 : i32
    %c0_i32_1 = arith.constant 0 : i32
    return %c0_i32, %c0_i32_0 : i32, i32
  }
  func.func @transform_6(%arg0: i32) -> (i32, i32) {
    %c0_i32 = arith.constant 0 : i32
    %c0_i32_0 = arith.constant 0 : i32
    %c0_i32_1 = arith.constant 0 : i32
    return %c0_i32, %c0_i32_0 : i32, i32
  }
  func.func @transform_7(%arg0: i32) -> (i32, i32) {
    %c0_i32 = arith.constant 0 : i32
    %c0_i32_0 = arith.constant 0 : i32
    return %arg0, %c0_i32 : i32, i32
  }
}

</mosaic_0001>

<bundles_post_ra>
// kernel: tpu_custom_call.1
= control target key start
LH: loop header
LB: loop body
LE: loop exit
PB: predicated region body
PF: predicated region fallthrough
CT: control target
= control target key end

     0   :  { %12 = vsyncpa [#allocation3], 0  ;;  %s585_s0 = inlined_call_operand.hbm [shape: f32[8,128], index: 0, kind: input, shape index: {}]   ;;  %s586_s1 = inlined_call_operand.hbm [shape: f32[128,384], index: 1, kind: input, shape index: {}]   ;;  %s587_s2 = inlined_call_operand.hbm [shape: f32[1,384], index: 2, kind: input, shape index: {}]   ;;  %s588_s3 = inlined_call_operand.hbm [shape: f32[1,128], index: 3, kind: input, shape index: {}]   ;;  %s589_s4 = inlined_call_operand.hbm [shape: f32[1,128], index: 4, kind: input, shape index: {}]   ;;  %s590_s5 = inlined_call_operand.vmem [shape: f32[3,128], index: 5, kind: input, shape index: {}]   ;;  %s591_s6 = inlined_call_operand.vmem [shape: f32[1,3], index: 6, kind: input, shape index: {}]   ;;  %s592_s7 = inlined_call_operand.vmem [shape: f32[8,3], index: 7, kind: output, shape index: {}]  }
   0x1   :  { %13 = vsyncpa [#allocation5], 0  ;;  %s30_s26 = sshll.u32 %s586_s1, 4  ;;  %s31_s26 = int_to_ptr.hbm [resolvable:$true] %s30_s26 }
   0x2   :  { %14 = vsyncpa [#allocation8], 0  ;;  %s496_s27 = smov [#allocation4]   ;;  %s55_s8 = sshll.u32 %s588_s3, 4  ;;  %s56_s8 = int_to_ptr.hbm [resolvable:$true] %s55_s8 }
   0x3   :  { %s32_s28 = sshll.u32 %s496_s27, 4  ;;  %s497_s9 = smov 384   ;;  %s33_s28 = int_to_ptr.vmem [resolvable:$true] %s32_s28 }
   0x4   :  { %s498_s10 = smov 24   ;;  %s499_s11 = smov [#allocation7]  }
   0x5   :  { %38 = dma.hbm_to_vmem [thread:$0]  %s31_s26, 6144, %s33_s28, [#allocation5], %s497_s9, %s497_s9, %s498_s10  }
   0x6   :  { %s57_s12 = sshll.u32 %s499_s11, 4  ;;  %s20_s15 = sshll.u32 %s585_s0, 4  ;;  %s58_s12 = int_to_ptr.vmem [resolvable:$true] %s57_s12  ;;  %s21_s15 = int_to_ptr.hbm [resolvable:$true] %s20_s15 }
   0x7   :  { %60 = dma.hbm_to_vmem [thread:$0]  %s56_s8, 16, %s58_s12, [#allocation8]  }
   0x8   :  { %s44_s17 = sshll.u32 %s587_s2, 4  ;;  %s500_s18 = smov [#allocation2]   ;;  %s45_s17 = int_to_ptr.hbm [resolvable:$true] %s44_s17 }
   0x9   :  { %s22_s19 = sshll.u32 %s500_s18, 4  ;;  %s501_s3 = smov [#allocation6]   ;;  %s23_s19 = int_to_ptr.vmem [resolvable:$true] %s22_s19 }
   0xa   :  { %25 = dma.hbm_to_vmem [thread:$0]  %s21_s15, 128, %s23_s19, [#allocation3]  }
   0xb   :  { %s46_s20 = sshll.u32 %s501_s3, 4  ;;  %s66_s23 = sshll.u32 %s589_s4, 4  ;;  %s47_s20 = int_to_ptr.vmem [resolvable:$true] %s46_s20  ;;  %s67_s23 = int_to_ptr.hbm [resolvable:$true] %s66_s23 }
   0xc   :  { %49 = dma.hbm_to_vmem [thread:$0]  %s45_s17, 48, %s47_s20, [#allocation5]  }
   0xd   :  { %s502_s0 = smov [#allocation9]  }
   0xe   :  { %s68_s24 = sshll.u32 %s502_s0, 4  ;;  %s69_s24 = int_to_ptr.vmem [resolvable:$true] %s68_s24 }
   0xf   :  { %71 = dma.hbm_to_vmem [thread:$0]  %s67_s23, 16, %s69_s24, [#allocation8]  }
  0x10   :  { %490 = dma.done.wait [#allocation3], 128  }
  0x11   :  { %491 = vsyncadd [#allocation3], 4294967168 }
  0x12   :  { %492 = dma.done.wait [#allocation5], 6192  }
  0x13   :  { %493 = vsyncadd [#allocation5], 4294961104 }
  0x14   :  { %494 = dma.done.wait [#allocation8], 32  }
  0x15   :  { %495 = vsyncadd [#allocation8], 4294967264  ;;  %v142_v0 = vld [vmem:[#allocation4 + $0x168] sm:$0xff]  ;;  %v143_v1 = vld [vmem:[#allocation4 + $0x170] sm:$0xff]  ;;  %vm312_vm9 = vcmask 7168   ;;  %vm314_vm10 = vcmask 15360  }
  0x16   :  { %v144_v2 = vld [vmem:[#allocation4 + $0x178] sm:$0xff]  ;;  %153 = vmatpush.msra.mxu0 %v142_v0  ;;  %173 = vmatpush.msra.mxu1 %v143_v1  ;;  %v139_v3 = vld [vmem:[#allocation4 + $0x150] sm:$0xff]  ;;  %v141_v5 = vld [vmem:[#allocation4 + $0x160] sm:$0xff]  ;;  %vm340_vm13 = vcmask 23552  }
  0x17   :  { %v140_v4 = vld [vmem:[#allocation4 + $0x158] sm:$0xff]  ;;  %193 = vmatpush.msra.mxu2 %v144_v2  ;;  %v137_v7 = vld [vmem:[#allocation4 + $0x140] sm:$0xff]  ;;  %v138_v8 = vld [vmem:[#allocation4 + $0x148] sm:$0xff] }
  0x18   :  { %v136_v6 = vld [vmem:[#allocation4 + $0x138] sm:$0xff]  ;;  %154 = vmatpush.msra.mxu0 %v139_v3  ;;  %174 = vmatpush.msra.mxu1 %v140_v4  ;;  %v133_v9 = vld [vmem:[#allocation4 + $0x120] sm:$0xff]  ;;  %v134_v10 = vld [vmem:[#allocation4 + $0x128] sm:$0xff] }
  0x19   :  { %194 = vmatpush.msra.mxu2 %v141_v5  ;;  %v135_v11 = vld [vmem:[#allocation4 + $0x130] sm:$0xff]  ;;  %v130_v12 = vld [vmem:[#allocation4 + $0x108] sm:$0xff]  ;;  %v132_v14 = vld [vmem:[#allocation4 + $0x118] sm:$0xff] }
  0x1a   :  { %155 = vmatpush.msra.mxu0 %v136_v6  ;;  %175 = vmatpush.msra.mxu1 %v137_v7  ;;  %v131_v13 = vld [vmem:[#allocation4 + $0x110] sm:$0xff]  ;;  %v128_v16 = vld [vmem:[#allocation4 + $0xf8] sm:$0xff]  ;;  %v129_v17 = vld [vmem:[#allocation4 + $0x100] sm:$0xff] }
  0x1b   :  { %195 = vmatpush.msra.mxu2 %v138_v8  ;;  %v127_v15 = vld [vmem:[#allocation4 + $0xf0] sm:$0xff]  ;;  %v124_v18 = vld [vmem:[#allocation4 + $0xd8] sm:$0xff]  ;;  %v125_v19 = vld [vmem:[#allocation4 + $0xe0] sm:$0xff] }
  0x1c   :  { %156 = vmatpush.msra.mxu0 %v133_v9  ;;  %176 = vmatpush.msra.mxu1 %v134_v10  ;;  %v126_v20 = vld [vmem:[#allocation4 + $0xe8] sm:$0xff]  ;;  %v121_v21 = vld [vmem:[#allocation4 + $0xc0] sm:$0xff]  ;;  %v123_v23 = vld [vmem:[#allocation4 + $0xd0] sm:$0xff] }
  0x1d   :  { %196 = vmatpush.msra.mxu2 %v135_v11  ;;  %v122_v22 = vld [vmem:[#allocation4 + $0xc8] sm:$0xff]  ;;  %v119_v25 = vld [vmem:[#allocation4 + $0xb0] sm:$0xff]  ;;  %v120_v26 = vld [vmem:[#allocation4 + $0xb8] sm:$0xff] }
  0x1e   :  { %157 = vmatpush.msra.mxu0 %v130_v12  ;;  %177 = vmatpush.msra.mxu1 %v131_v13  ;;  %v118_v24 = vld [vmem:[#allocation4 + $0xa8] sm:$0xff]  ;;  %v115_v27 = vld [vmem:[#allocation4 + $0x90] sm:$0xff]  ;;  %v116_v28 = vld [vmem:[#allocation4 + $0x98] sm:$0xff] }
  0x1f   :  { %197 = vmatpush.msra.mxu2 %v132_v14  ;;  %v117_v29 = vld [vmem:[#allocation4 + $0xa0] sm:$0xff]  ;;  %v112_v30 = vld [vmem:[#allocation4 + $0x78] sm:$0xff]  ;;  %v114_v32 = vld [vmem:[#allocation4 + $0x88] sm:$0xff] }
  0x20   :  { %158 = vmatpush.msra.mxu0 %v127_v15  ;;  %178 = vmatpush.msra.mxu1 %v128_v16  ;;  %v113_v31 = vld [vmem:[#allocation4 + $0x80] sm:$0xff]  ;;  %v110_v34 = vld [vmem:[#allocation4 + $0x68] sm:$0xff]  ;;  %v111_v35 = vld [vmem:[#allocation4 + $0x70] sm:$0xff] }
  0x21   :  { %198 = vmatpush.msra.mxu2 %v129_v17  ;;  %v109_v33 = vld [vmem:[#allocation4 + $0x60] sm:$0xff]  ;;  %v106_v36 = vld [vmem:[#allocation4 + $0x48] sm:$0xff]  ;;  %v107_v37 = vld [vmem:[#allocation4 + $0x50] sm:$0xff] }
  0x22   :  { %159 = vmatpush.msra.mxu0 %v124_v18  ;;  %179 = vmatpush.msra.mxu1 %v125_v19  ;;  %v108_v38 = vld [vmem:[#allocation4 + $0x58] sm:$0xff]  ;;  %v103_v39 = vld [vmem:[#allocation4 + $0x30] sm:$0xff]  ;;  %v105_v41 = vld [vmem:[#allocation4 + $0x40] sm:$0xff] }
  0x23   :  { %199 = vmatpush.msra.mxu2 %v126_v20  ;;  %v104_v40 = vld [vmem:[#allocation4 + $0x38] sm:$0xff]  ;;  %v101_v43 = vld [vmem:[#allocation4 + $0x20] sm:$0xff]  ;;  %v102_v44 = vld [vmem:[#allocation4 + $0x28] sm:$0xff] }
  0x24   :  { %160 = vmatpush.msra.mxu0 %v121_v21  ;;  %180 = vmatpush.msra.mxu1 %v122_v22  ;;  %v100_v42 = vld [vmem:[#allocation4 + $0x18] sm:$0xff]  ;;  %v97_v45 = vld [vmem:[#allocation4] sm:$0xff]  ;;  %v98_v46 = vld [vmem:[#allocation4 + $0x8] sm:$0xff] }
  0x25   :  { %200 = vmatpush.msra.mxu2 %v123_v23  ;;  %v99_v47 = vld [vmem:[#allocation4 + $0x10] sm:$0xff]  ;;  %v96_v48 = vld [vmem:[#allocation2] sm:$0xff]  ;;  %v145_v49 = vld [vmem:[#allocation6] sm:$0x7] }
  0x26   :  { %161 = vmatpush.msra.mxu0 %v118_v24  ;;  %181 = vmatpush.msra.mxu1 %v119_v25  ;;  %v147_v50 = vperm.slane %v145_v49, 0  ;;  %v148_v51 = vperm.slane %v145_v49, 1  ;;  %v149_v58 = vperm.slane %v145_v49, 2 }
  0x27   :  { %201 = vmatpush.msra.mxu2 %v120_v26 }
  0x28   :  { %162 = vmatpush.msra.mxu0 %v115_v27  ;;  %182 = vmatpush.msra.mxu1 %v116_v28 }
  0x29   :  { %202 = vmatpush.msra.mxu2 %v117_v29 }
  0x2a   :  { %163 = vmatpush.msra.mxu0 %v112_v30  ;;  %183 = vmatpush.msra.mxu1 %v113_v31 }
  0x2b   :  { %203 = vmatpush.msra.mxu2 %v114_v32 }
  0x2c   :  { %164 = vmatpush.msra.mxu0 %v109_v33  ;;  %184 = vmatpush.msra.mxu1 %v110_v34 }
  0x2d   :  { %204 = vmatpush.msra.mxu2 %v111_v35 }
  0x2e   :  { %165 = vmatpush.msra.mxu0 %v106_v36  ;;  %185 = vmatpush.msra.mxu1 %v107_v37 }
  0x2f   :  { %205 = vmatpush.msra.mxu2 %v108_v38 }
  0x30   :  { %166 = vmatpush.msra.mxu0 %v103_v39  ;;  %186 = vmatpush.msra.mxu1 %v104_v40  ;;  %v357_v39 = vld [vmem:[#allocation7] ss:$0 sm:$0xff] }
  0x31   :  { %206 = vmatpush.msra.mxu2 %v105_v41 }
  0x32   :  { %167 = vmatpush.msra.mxu0 %v100_v42  ;;  %187 = vmatpush.msra.mxu1 %v101_v43 }
  0x33   :  { %207 = vmatpush.msra.mxu2 %v102_v44  ;;  %v358_v44 = vld [vmem:[#allocation9] ss:$0 sm:$0xff] }
  0x34   :  { %168 = vmatpush.msra.mxu0 %v97_v45  ;;  %188 = vmatpush.msra.mxu1 %v98_v46  ;;  %v215_v46 = vld [vmem:[%s590_s5] sm:$0x7] }
  0x35   :  { %208 = vmatpush.msra.mxu2 %v99_v47  ;;  %169 = vmatmul.f32.vlgmr.msra.gmra.mxu0 %v96_v48 }
  0x36   :  { %189 = vmatmul.f32.vlgmr.msra.gmra.mxu1 %v96_v48  ;;  %209 = vmatmul.f32.vlgmr.msra.gmra.mxu2 %v96_v48 }
  0xb2   :  { %v170_v52 = vpop.f32.mrf.mxu0 }
  0xb3   :  { %v171_v53 = vadd.f32 %v170_v52, %v147_v50  ;;  %v190_v54 = vpop.f32.mrf.mxu1 }
  0xb4   :  { %v191_v55 = vadd.f32 %v190_v54, %v148_v51 }
  0xb5   :  { %v558_v56 = vadd.f32 %v171_v53, %v96_v48  ;;  %v278_v53 = vperm.slane %v215_v46, 1 }
  0xb6   :  { %v560_v57 = vadd.f32 %v191_v55, %v96_v48 }
  0xb7   :  { %217 = vadd.xlane.f32.xlu0 %v558_v56  ;;  %v219_v0 = vmul.f32 %v558_v56, %v558_v56 }
  0xb8   :  { %v255_v59 = vmul.f32 %v560_v57, %v560_v57 }
  0xb9   :  { %v210_v60 = vpop.f32.mrf.mxu2 }
  0xba   :  { %v211_v61 = vadd.f32 %v210_v60, %v149_v58  ;;  %256 = vadd.xlane.f32.xlu2 %v255_v59 }
  0xbc   :  { %v565_v62 = vadd.f32 %v211_v61, %v96_v48 }
  0xbe   :  { %283 = vadd.xlane.f32.xlu1 %v565_v62  ;;  %v285_v63 = vmul.f32 %v565_v62, %v565_v62 }
  0xbf   :  { %253 = vadd.xlane.f32.xlu0 %v560_v57 }
  0xc2   :  { %286 = vadd.xlane.f32.xlu2 %v285_v63 }
  0xc6   :  { %220 = vadd.xlane.f32.xlu1 %v219_v0 }
 0x12a   :  { %v218_v1 = vpop.xlane.xlu0 %217 }
 0x12b   :  { %v222_v13 = vmul.f32 0.0078125, %v218_v1  ;;  %v248_v1 = vperm.slane %v215_v46, 0 }
 0x12d   :  { %v257_v2 = vpop.xlane.xlu2 %256  ;;  %v224_v17 = vmul.f32 %v222_v13, %v222_v13  ;;  %v226_v50 = vsub.f32 %v558_v56, %v222_v13  ;;  %v359_v56 = vld [vmem:[%s591_s6] ss:$0 sm:$0xff] }
 0x12e   :  { %v259_v7 = vmul.f32 0.0078125, %v257_v2 }
 0x131   :  { %v284_v3 = vpop.xlane.xlu1 %283 }
 0x132   :  { %v288_v4 = vmul.f32 0.0078125, %v284_v3  ;;  %v254_v5 = vpop.xlane.xlu0 %253 }
 0x133   :  { %v258_v6 = vmul.f32 0.0078125, %v254_v5 }
 0x134   :  { %v290_v10 = vmul.f32 %v288_v4, %v288_v4  ;;  %v292_v40 = vsub.f32 %v565_v62, %v288_v4 }
 0x135   :  { %v260_v8 = vmul.f32 %v258_v6, %v258_v6  ;;  %v287_v9 = vpop.xlane.xlu2 %286  ;;  %v262_v36 = vsub.f32 %v560_v57, %v258_v6  ;;  %v308_v57 = vperm.slane %v215_v46, 2 }
 0x136   :  { %v289_v11 = vmul.f32 0.0078125, %v287_v9 }
 0x137   :  { %v261_v12 = vsub.f32 %v259_v7, %v260_v8 }
 0x138   :  { %v291_v14 = vsub.f32 %v289_v11, %v290_v10 }
 0x139   :  { %v263_v15 = vadd.f32 1e-05, %v261_v12  ;;  %v221_v16 = vpop.xlane.xlu1 %220 }
 0x13a   :  { %v293_v18 = vadd.f32 1e-05, %v291_v14  ;;  %v223_v19 = vmul.f32 0.0078125, %v221_v16 }
 0x13b   :  { %360 = vrsqrt.f32 %v263_v15  ;;  %vm270_vm2 = vweird.f32 %v263_v15 }
 0x13c   :  { %362 = vrsqrt.f32 %v293_v18  ;;  %v225_v20 = vsub.f32 %v223_v19, %v224_v17  ;;  %vm300_vm4 = vweird.f32 %v293_v18 }
 0x13e   :  { %v227_v21 = vadd.f32 1e-05, %v225_v20 }
 0x140   :  { %364 = vrsqrt.f32 %v227_v21  ;;  %vm234_vm7 = vweird.f32 %v227_v21 }
 0x141   :  { %v361_v22 = vpop.eup %360 }
 0x142   :  { %v363_v23 = vpop.eup %362  ;;  %v265_v24 = vmul.f32 %v361_v22, %v263_v15  ;;  %vm271_vm0 = vweird.f32 %v361_v22 }
 0x143   :  { %v295_v25 = vmul.f32 %v363_v23, %v293_v18  ;;  %vm301_vm1 = vweird.f32 %v363_v23  ;;  %vm272_vm3 = vmor %vm270_vm2, %vm271_vm0 }
 0x144   :  { %v266_v26 = vmul.f32 %v361_v22, %v265_v24  ;;  %vm302_vm5 = vmor %vm300_vm4, %vm301_vm1 }
 0x145   :  { %v296_v27 = vmul.f32 %v363_v23, %v295_v25 }
 0x146   :  { %v365_v28 = vpop.eup %364  ;;  %v267_v29 = vmul.f32 0.5, %v266_v26 }
 0x147   :  { %v297_v30 = vmul.f32 0.5, %v296_v27  ;;  %v229_v31 = vmul.f32 %v365_v28, %v227_v21  ;;  %vm235_vm6 = vweird.f32 %v365_v28 }
 0x148   :  { %v268_v32 = vsub.f32 1.5, %v267_v29  ;;  %vm236_vm8 = vmor %vm234_vm7, %vm235_vm6 }
 0x149   :  { %v298_v33 = vsub.f32 1.5, %v297_v30  ;;  %v230_v34 = vmul.f32 %v365_v28, %v229_v31 }
 0x14a   :  { %v269_v35 = vmul.f32 %v361_v22, %v268_v32 }
 0x14b   :  { %v299_v37 = vmul.f32 %v363_v23, %v298_v33  ;;  %v231_v38 = vmul.f32 0.5, %v230_v34 }
 0x14c   :  { %v273_v41 = vsel %vm272_vm3, %v361_v22, %v269_v35 }
 0x14d   :  { %v274_v42 = vmul.f32 %v273_v41, %v262_v36  ;;  %v232_v43 = vsub.f32 1.5, %v231_v38  ;;  %v303_v45 = vsel %vm302_vm5, %v363_v23, %v299_v37 }
 0x14e   :  { %v304_v47 = vmul.f32 %v303_v45, %v292_v40 }
 0x14f   :  { %v233_v48 = vmul.f32 %v365_v28, %v232_v43  ;;  %v275_v49 = vmul.f32 %v357_v39, %v274_v42 }
 0x150   :  { %v305_v51 = vmul.f32 %v357_v39, %v304_v47 }
 0x151   :  { %v276_v52 = vadd.f32 %v358_v44, %v275_v49  ;;  %v237_v54 = vsel %vm236_vm8, %v365_v28, %v233_v48 }
 0x152   :  { %v306_v55 = vadd.f32 %v358_v44, %v305_v51  ;;  %v238_v58 = vmul.f32 %v237_v54, %v226_v50 }
 0x153   :  { %v277_v59 = vmax.f32 %v276_v52, 0.0 }
 0x154   :  { %v307_v60 = vmax.f32 %v306_v55, 0.0  ;;  %v242_v61 = vmul.f32 %v357_v39, %v238_v58 }
 0x155   :  { %v279_v62 = vmul.f32 %v278_v53, %v277_v59 }
 0x156   :  { %v309_v63 = vmul.f32 %v308_v57, %v307_v60  ;;  %v246_v0 = vadd.f32 %v358_v44, %v242_v61 }
 0x157   :  { %280 = vadd.xlane.f32.xlu1 %v279_v62 }
 0x158   :  { %310 = vadd.xlane.f32.xlu2 %v309_v63  ;;  %v247_v2 = vmax.f32 %v246_v0, 0.0 }
 0x15a   :  { %v249_v3 = vmul.f32 %v248_v1, %v247_v2 }
 0x15c   :  { %250 = vadd.xlane.f32.xlu0 %v249_v3 }
 0x1ca   :  { %v281_v4 = vpop.xlane.xlu1 %280 }
 0x1cb   :  { %v311_v6 = vpop.xlane.xlu2 %310 }
 0x1cf   :  { %v251_v5 = vpop.xlane.xlu0 %250 }
 0x1d0   :  { %v313_v7 = vsel %vm312_vm9, %v251_v5, %v281_v4 }
 0x1d1   :  { %v315_v8 = vsel %vm314_vm10, %v313_v7, %v311_v6 }
 0x1d2   :  { %v320_v9 = vadd.f32 %v359_v56, %v315_v8 }
 0x1d4   :  { %v349_v10 = vmul.f32 -1.442695, %v320_v9 }
 0x1d6   :  { %366 = vpow2.f32 %v349_v10 }
 0x1dc   :  { %v367_v11 = vpop.eup %366 }
 0x1dd   :  { %v324_v12 = vadd.f32 1.0, %v367_v11 }
 0x1df   :  { %368 = vrcp.f32 %v324_v12  ;;  %v336_v16 = vand.u32 2147483648, %v324_v12  ;;  %v334_v18 = vand.u32 2147483647, %v324_v12  ;;  %vm330_vm12 = vweird.f32 %v324_v12 }
 0x1e1   :  { %v337_v20 = vor.u32 1.1754944e-38, %v336_v16  ;;  %vm335_vm15 = vcmp.eq.f32.partialorder %v334_v18, 8.507059e+37 }
 0x1e5   :  { %v369_v13 = vpop.eup %368 }
 0x1e6   :  { %v326_v14 = vmul.f32 %v369_v13, %v324_v12  ;;  %vm331_vm11 = vweird.f32 %v369_v13 }
 0x1e7   :  { %vm332_vm14 = vmor %vm330_vm12, %vm331_vm11 }
 0x1e8   :  { %v327_v15 = vsub.f32 1.0, %v326_v14 }
 0x1ea   :  { %v328_v17 = vmul.f32 %v369_v13, %v327_v15 }
 0x1ec   :  { %v329_v19 = vadd.f32 %v369_v13, %v328_v17 }
 0x1ee   :  { %v333_v21 = vsel %vm332_vm14, %v369_v13, %v329_v19 }
 0x1ef   :  { %v338_v22 = vsel %vm335_vm15, %v337_v20, %v333_v21 }
 0x1f0   :  { %341 = vst.msk [vmem:[%s592_s7] sm:$0xff] %vm340_vm13, %v338_v22 }
 0x1f1   :  { %346 = vsyncpa [#allocation3], 1 }
 0x1f2   :  { %347 = vsyncpa [#allocation5], 1 }
 0x1f3   :  { %348 = vsyncpa [#allocation8], 1 }

// kernel: tpu_custom_call.1
= control target key start
LH: loop header
LB: loop body
LE: loop exit
PB: predicated region body
PF: predicated region fallthrough
CT: control target
= control target key end

     0   :  { %12 = vsyncpa [#allocation3], 0  ;;  %s585_s0 = inlined_call_operand.hbm [shape: f32[8,128], index: 0, kind: input, shape index: {}]   ;;  %s586_s1 = inlined_call_operand.hbm [shape: f32[128,384], index: 1, kind: input, shape index: {}]   ;;  %s587_s2 = inlined_call_operand.hbm [shape: f32[1,384], index: 2, kind: input, shape index: {}]   ;;  %s588_s3 = inlined_call_operand.hbm [shape: f32[1,128], index: 3, kind: input, shape index: {}]   ;;  %s589_s4 = inlined_call_operand.hbm [shape: f32[1,128], index: 4, kind: input, shape index: {}]   ;;  %s590_s5 = inlined_call_operand.vmem [shape: f32[3,128], index: 5, kind: input, shape index: {}]   ;;  %s591_s6 = inlined_call_operand.vmem [shape: f32[1,3], index: 6, kind: input, shape index: {}]   ;;  %s592_s7 = inlined_call_operand.vmem [shape: f32[8,3], index: 7, kind: output, shape index: {}]  }
   0x1   :  { %13 = vsyncpa [#allocation5], 0  ;;  %s30_s26 = sshll.u32 %s586_s1, 4  ;;  %s31_s26 = int_to_ptr.hbm [resolvable:$true] %s30_s26 }
   0x2   :  { %14 = vsyncpa [#allocation8], 0  ;;  %s496_s27 = smov [#allocation4]   ;;  %s55_s8 = sshll.u32 %s588_s3, 4  ;;  %s56_s8 = int_to_ptr.hbm [resolvable:$true] %s55_s8 }
   0x3   :  { %s32_s28 = sshll.u32 %s496_s27, 4  ;;  %s497_s9 = smov 384   ;;  %s33_s28 = int_to_ptr.vmem [resolvable:$true] %s32_s28 }
   0x4   :  { %s498_s10 = smov 24   ;;  %s499_s11 = smov [#allocation7]  }
   0x5   :  { %38 = dma.hbm_to_vmem [thread:$0]  %s31_s26, 6144, %s33_s28, [#allocation5], %s497_s9, %s497_s9, %s498_s10  }
   0x6   :  { %s57_s12 = sshll.u32 %s499_s11, 4  ;;  %s20_s15 = sshll.u32 %s585_s0, 4  ;;  %s58_s12 = int_to_ptr.vmem [resolvable:$true] %s57_s12  ;;  %s21_s15 = int_to_ptr.hbm [resolvable:$true] %s20_s15 }
   0x7   :  { %60 = dma.hbm_to_vmem [thread:$0]  %s56_s8, 16, %s58_s12, [#allocation8]  }
   0x8   :  { %s44_s17 = sshll.u32 %s587_s2, 4  ;;  %s500_s18 = smov [#allocation2]   ;;  %s45_s17 = int_to_ptr.hbm [resolvable:$true] %s44_s17 }
   0x9   :  { %s22_s19 = sshll.u32 %s500_s18, 4  ;;  %s501_s3 = smov [#allocation6]   ;;  %s23_s19 = int_to_ptr.vmem [resolvable:$true] %s22_s19 }
   0xa   :  { %25 = dma.hbm_to_vmem [thread:$0]  %s21_s15, 128, %s23_s19, [#allocation3]  }
   0xb   :  { %s46_s20 = sshll.u32 %s501_s3, 4  ;;  %s66_s23 = sshll.u32 %s589_s4, 4  ;;  %s47_s20 = int_to_ptr.vmem [resolvable:$true] %s46_s20  ;;  %s67_s23 = int_to_ptr.hbm [resolvable:$true] %s66_s23 }
   0xc   :  { %49 = dma.hbm_to_vmem [thread:$0]  %s45_s17, 48, %s47_s20, [#allocation5]  }
   0xd   :  { %s502_s0 = smov [#allocation9]  }
   0xe   :  { %s68_s24 = sshll.u32 %s502_s0, 4  ;;  %s69_s24 = int_to_ptr.vmem [resolvable:$true] %s68_s24 }
   0xf   :  { %71 = dma.hbm_to_vmem [thread:$0]  %s67_s23, 16, %s69_s24, [#allocation8]  }
  0x10   :  { %490 = dma.done.wait [#allocation3], 128  }
  0x11   :  { %491 = vsyncadd [#allocation3], 4294967168 }
  0x12   :  { %492 = dma.done.wait [#allocation5], 6192  }
  0x13   :  { %493 = vsyncadd [#allocation5], 4294961104 }
  0x14   :  { %494 = dma.done.wait [#allocation8], 32  }
  0x15   :  { %495 = vsyncadd [#allocation8], 4294967264  ;;  %v142_v0 = vld [vmem:[#allocation4 + $0x168] sm:$0xff]  ;;  %v143_v1 = vld [vmem:[#allocation4 + $0x170] sm:$0xff]  ;;  %vm312_vm9 = vcmask 7168   ;;  %vm314_vm10 = vcmask 15360  }
  0x16   :  { %v144_v2 = vld [vmem:[#allocation4 + $0x178] sm:$0xff]  ;;  %153 = vmatpush.msra.mxu0 %v142_v0  ;;  %173 = vmatpush.msra.mxu1 %v143_v1  ;;  %v139_v3 = vld [vmem:[#allocation4 + $0x150] sm:$0xff]  ;;  %v141_v5 = vld [vmem:[#allocation4 + $0x160] sm:$0xff]  ;;  %vm340_vm13 = vcmask 23552  }
  0x17   :  { %v140_v4 = vld [vmem:[#allocation4 + $0x158] sm:$0xff]  ;;  %193 = vmatpush.msra.mxu2 %v144_v2  ;;  %v137_v7 = vld [vmem:[#allocation4 + $0x140] sm:$0xff]  ;;  %v138_v8 = vld [vmem:[#allocation4 + $0x148] sm:$0xff] }
  0x18   :  { %v136_v6 = vld [vmem:[#allocation4 + $0x138] sm:$0xff]  ;;  %154 = vmatpush.msra.mxu0 %v139_v3  ;;  %174 = vmatpush.msra.mxu1 %v140_v4  ;;  %v133_v9 = vld [vmem:[#allocation4 + $0x120] sm:$0xff]  ;;  %v134_v10 = vld [vmem:[#allocation4 + $0x128] sm:$0xff] }
  0x19   :  { %194 = vmatpush.msra.mxu2 %v141_v5  ;;  %v135_v11 = vld [vmem:[#allocation4 + $0x130] sm:$0xff]  ;;  %v130_v12 = vld [vmem:[#allocation4 + $0x108] sm:$0xff]  ;;  %v132_v14 = vld [vmem:[#allocation4 + $0x118] sm:$0xff] }
  0x1a   :  { %155 = vmatpush.msra.mxu0 %v136_v6  ;;  %175 = vmatpush.msra.mxu1 %v137_v7  ;;  %v131_v13 = vld [vmem:[#allocation4 + $0x110] sm:$0xff]  ;;  %v128_v16 = vld [vmem:[#allocation4 + $0xf8] sm:$0xff]  ;;  %v129_v17 = vld [vmem:[#allocation4 + $0x100] sm:$0xff] }
  0x1b   :  { %195 = vmatpush.msra.mxu2 %v138_v8  ;;  %v127_v15 = vld [vmem:[#allocation4 + $0xf0] sm:$0xff]  ;;  %v124_v18 = vld [vmem:[#allocation4 + $0xd8] sm:$0xff]  ;;  %v125_v19 = vld [vmem:[#allocation4 + $0xe0] sm:$0xff] }
  0x1c   :  { %156 = vmatpush.msra.mxu0 %v133_v9  ;;  %176 = vmatpush.msra.mxu1 %v134_v10  ;;  %v126_v20 = vld [vmem:[#allocation4 + $0xe8] sm:$0xff]  ;;  %v121_v21 = vld [vmem:[#allocation4 + $0xc0] sm:$0xff]  ;;  %v123_v23 = vld [vmem:[#allocation4 + $0xd0] sm:$0xff] }
  0x1d   :  { %196 = vmatpush.msra.mxu2 %v135_v11  ;;  %v122_v22 = vld [vmem:[#allocation4 + $0xc8] sm:$0xff]  ;;  %v119_v25 = vld [vmem:[#allocation4 + $0xb0] sm:$0xff]  ;;  %v120_v26 = vld [vmem:[#allocation4 + $0xb8] sm:$0xff] }
  0x1e   :  { %157 = vmatpush.msra.mxu0 %v130_v12  ;;  %177 = vmatpush.msra.mxu1 %v131_v13  ;;  %v118_v24 = vld [vmem:[#allocation4 + $0xa8] sm:$0xff]  ;;  %v115_v27 = vld [vmem:[#allocation4 + $0x90] sm:$0xff]  ;;  %v116_v28 = vld [vmem:[#allocation4 + $0x98] sm:$0xff] }
  0x1f   :  { %197 = vmatpush.msra.mxu2 %v132_v14  ;;  %v117_v29 = vld [vmem:[#allocation4 + $0xa0] sm:$0xff]  ;;  %v112_v30 = vld [vmem:[#allocation4 + $0x78] sm:$0xff]  ;;  %v114_v32 = vld [vmem:[#allocation4 + $0x88] sm:$0xff] }
  0x20   :  { %158 = vmatpush.msra.mxu0 %v127_v15  ;;  %178 = vmatpush.msra.mxu1 %v128_v16  ;;  %v113_v31 = vld [vmem:[#allocation4 + $0x80] sm:$0xff]  ;;  %v110_v34 = vld [vmem:[#allocation4 + $0x68] sm:$0xff]  ;;  %v111_v35 = vld [vmem:[#allocation4 + $0x70] sm:$0xff] }
  0x21   :  { %198 = vmatpush.msra.mxu2 %v129_v17  ;;  %v109_v33 = vld [vmem:[#allocation4 + $0x60] sm:$0xff]  ;;  %v106_v36 = vld [vmem:[#allocation4 + $0x48] sm:$0xff]  ;;  %v107_v37 = vld [vmem:[#allocation4 + $0x50] sm:$0xff] }
  0x22   :  { %159 = vmatpush.msra.mxu0 %v124_v18  ;;  %179 = vmatpush.msra.mxu1 %v125_v19  ;;  %v108_v38 = vld [vmem:[#allocation4 + $0x58] sm:$0xff]  ;;  %v103_v39 = vld [vmem:[#allocation4 + $0x30] sm:$0xff]  ;;  %v105_v41 = vld [vmem:[#allocation4 + $0x40] sm:$0xff] }
  0x23   :  { %199 = vmatpush.msra.mxu2 %v126_v20  ;;  %v104_v40 = vld [vmem:[#allocation4 + $0x38] sm:$0xff]  ;;  %v101_v43 = vld [vmem:[#allocation4 + $0x20] sm:$0xff]  ;;  %v102_v44 = vld [vmem:[#allocation4 + $0x28] sm:$0xff] }
  0x24   :  { %160 = vmatpush.msra.mxu0 %v121_v21  ;;  %180 = vmatpush.msra.mxu1 %v122_v22  ;;  %v100_v42 = vld [vmem:[#allocation4 + $0x18] sm:$0xff]  ;;  %v97_v45 = vld [vmem:[#allocation4] sm:$0xff]  ;;  %v98_v46 = vld [vmem:[#allocation4 + $0x8] sm:$0xff] }
  0x25   :  { %200 = vmatpush.msra.mxu2 %v123_v23  ;;  %v99_v47 = vld [vmem:[#allocation4 + $0x10] sm:$0xff]  ;;  %v96_v48 = vld [vmem:[#allocation2] sm:$0xff]  ;;  %v145_v49 = vld [vmem:[#allocation6] sm:$0x7] }
  0x26   :  { %161 = vmatpush.msra.mxu0 %v118_v24  ;;  %181 = vmatpush.msra.mxu1 %v119_v25  ;;  %v147_v50 = vperm.slane %v145_v49, 0  ;;  %v148_v51 = vperm.slane %v145_v49, 1  ;;  %v149_v58 = vperm.slane %v145_v49, 2 }
  0x27   :  { %201 = vmatpush.msra.mxu2 %v120_v26 }
  0x28   :  { %162 = vmatpush.msra.mxu0 %v115_v27  ;;  %182 = vmatpush.msra.mxu1 %v116_v28 }
  0x29   :  { %202 = vmatpush.msra.mxu2 %v117_v29 }
  0x2a   :  { %163 = vmatpush.msra.mxu0 %v112_v30  ;;  %183 = vmatpush.msra.mxu1 %v113_v31 }
  0x2b   :  { %203 = vmatpush.msra.mxu2 %v114_v32 }
  0x2c   :  { %164 = vmatpush.msra.mxu0 %v109_v33  ;;  %184 = vmatpush.msra.mxu1 %v110_v34 }
  0x2d   :  { %204 = vmatpush.msra.mxu2 %v111_v35 }
  0x2e   :  { %165 = vmatpush.msra.mxu0 %v106_v36  ;;  %185 = vmatpush.msra.mxu1 %v107_v37 }
  0x2f   :  { %205 = vmatpush.msra.mxu2 %v108_v38 }
  0x30   :  { %166 = vmatpush.msra.mxu0 %v103_v39  ;;  %186 = vmatpush.msra.mxu1 %v104_v40  ;;  %v357_v39 = vld [vmem:[#allocation7] ss:$0 sm:$0xff] }
  0x31   :  { %206 = vmatpush.msra.mxu2 %v105_v41 }
  0x32   :  { %167 = vmatpush.msra.mxu0 %v100_v42  ;;  %187 = vmatpush.msra.mxu1 %v101_v43 }
  0x33   :  { %207 = vmatpush.msra.mxu2 %v102_v44  ;;  %v358_v44 = vld [vmem:[#allocation9] ss:$0 sm:$0xff] }
  0x34   :  { %168 = vmatpush.msra.mxu0 %v97_v45  ;;  %188 = vmatpush.msra.mxu1 %v98_v46  ;;  %v215_v46 = vld [vmem:[%s590_s5] sm:$0x7] }
  0x35   :  { %208 = vmatpush.msra.mxu2 %v99_v47  ;;  %169 = vmatmul.f32.vlgmr.msra.gmra.mxu0 %v96_v48 }
  0x36   :  { %189 = vmatmul.f32.vlgmr.msra.gmra.mxu1 %v96_v48  ;;  %209 = vmatmul.f32.vlgmr.msra.gmra.mxu2 %v96_v48 }
  0xb2   :  { %v170_v52 = vpop.f32.mrf.mxu0 }
  0xb3   :  { %v171_v53 = vadd.f32 %v170_v52, %v147_v50  ;;  %v190_v54 = vpop.f32.mrf.mxu1 }
  0xb4   :  { %v191_v55 = vadd.f32 %v190_v54, %v148_v51 }
  0xb5   :  { %v558_v56 = vadd.f32 %v171_v53, %v96_v48  ;;  %v278_v53 = vperm.slane %v215_v46, 1 }
  0xb6   :  { %v560_v57 = vadd.f32 %v191_v55, %v96_v48 }
  0xb7   :  { %217 = vadd.xlane.f32.xlu0 %v558_v56  ;;  %v219_v0 = vmul.f32 %v558_v56, %v558_v56 }
  0xb8   :  { %v255_v59 = vmul.f32 %v560_v57, %v560_v57 }
  0xb9   :  { %v210_v60 = vpop.f32.mrf.mxu2 }
  0xba   :  { %v211_v61 = vadd.f32 %v210_v60, %v149_v58  ;;  %256 = vadd.xlane.f32.xlu2 %v255_v59 }
  0xbc   :  { %v565_v62 = vadd.f32 %v211_v61, %v96_v48 }
  0xbe   :  { %283 = vadd.xlane.f32.xlu1 %v565_v62  ;;  %v285_v63 = vmul.f32 %v565_v62, %v565_v62 }
  0xbf   :  { %253 = vadd.xlane.f32.xlu0 %v560_v57 }
  0xc2   :  { %286 = vadd.xlane.f32.xlu2 %v285_v63 }
  0xc6   :  { %220 = vadd.xlane.f32.xlu1 %v219_v0 }
 0x12a   :  { %v218_v1 = vpop.xlane.xlu0 %217 }
 0x12b   :  { %v222_v13 = vmul.f32 0.0078125, %v218_v1  ;;  %v248_v1 = vperm.slane %v215_v46, 0 }
 0x12d   :  { %v257_v2 = vpop.xlane.xlu2 %256  ;;  %v224_v17 = vmul.f32 %v222_v13, %v222_v13  ;;  %v226_v50 = vsub.f32 %v558_v56, %v222_v13  ;;  %v359_v56 = vld [vmem:[%s591_s6] ss:$0 sm:$0xff] }
 0x12e   :  { %v259_v7 = vmul.f32 0.0078125, %v257_v2 }
 0x131   :  { %v284_v3 = vpop.xlane.xlu1 %283 }
 0x132   :  { %v288_v4 = vmul.f32 0.0078125, %v284_v3  ;;  %v254_v5 = vpop.xlane.xlu0 %253 }
 0x133   :  { %v258_v6 = vmul.f32 0.0078125, %v254_v5 }
 0x134   :  { %v290_v10 = vmul.f32 %v288_v4, %v288_v4  ;;  %v292_v40 = vsub.f32 %v565_v62, %v288_v4 }
 0x135   :  { %v260_v8 = vmul.f32 %v258_v6, %v258_v6  ;;  %v287_v9 = vpop.xlane.xlu2 %286  ;;  %v262_v36 = vsub.f32 %v560_v57, %v258_v6  ;;  %v308_v57 = vperm.slane %v215_v46, 2 }
 0x136   :  { %v289_v11 = vmul.f32 0.0078125, %v287_v9 }
 0x137   :  { %v261_v12 = vsub.f32 %v259_v7, %v260_v8 }
 0x138   :  { %v291_v14 = vsub.f32 %v289_v11, %v290_v10 }
 0x139   :  { %v263_v15 = vadd.f32 1e-05, %v261_v12  ;;  %v221_v16 = vpop.xlane.xlu1 %220 }
 0x13a   :  { %v293_v18 = vadd.f32 1e-05, %v291_v14  ;;  %v223_v19 = vmul.f32 0.0078125, %v221_v16 }
 0x13b   :  { %360 = vrsqrt.f32 %v263_v15  ;;  %vm270_vm2 = vweird.f32 %v263_v15 }
 0x13c   :  { %362 = vrsqrt.f32 %v293_v18  ;;  %v225_v20 = vsub.f32 %v223_v19, %v224_v17  ;;  %vm300_vm4 = vweird.f32 %v293_v18 }
 0x13e   :  { %v227_v21 = vadd.f32 1e-05, %v225_v20 }
 0x140   :  { %364 = vrsqrt.f32 %v227_v21  ;;  %vm234_vm7 = vweird.f32 %v227_v21 }
 0x141   :  { %v361_v22 = vpop.eup %360 }
 0x142   :  { %v363_v23 = vpop.eup %362  ;;  %v265_v24 = vmul.f32 %v361_v22, %v263_v15  ;;  %vm271_vm0 = vweird.f32 %v361_v22 }
 0x143   :  { %v295_v25 = vmul.f32 %v363_v23, %v293_v18  ;;  %vm301_vm1 = vweird.f32 %v363_v23  ;;  %vm272_vm3 = vmor %vm270_vm2, %vm271_vm0 }
 0x144   :  { %v266_v26 = vmul.f32 %v361_v22, %v265_v24  ;;  %vm302_vm5 = vmor %vm300_vm4, %vm301_vm1 }
 0x145   :  { %v296_v27 = vmul.f32 %v363_v23, %v295_v25 }
 0x146   :  { %v365_v28 = vpop.eup %364  ;;  %v267_v29 = vmul.f32 0.5, %v266_v26 }
 0x147   :  { %v297_v30 = vmul.f32 0.5, %v296_v27  ;;  %v229_v31 = vmul.f32 %v365_v28, %v227_v21  ;;  %vm235_vm6 = vweird.f32 %v365_v28 }
 0x148   :  { %v268_v32 = vsub.f32 1.5, %v267_v29  ;;  %vm236_vm8 = vmor %vm234_vm7, %vm235_vm6 }
 0x149   :  { %v298_v33 = vsub.f32 1.5, %v297_v30  ;;  %v230_v34 = vmul.f32 %v365_v28, %v229_v31 }
 0x14a   :  { %v269_v35 = vmul.f32 %v361_v22, %v268_v32 }
 0x14b   :  { %v299_v37 = vmul.f32 %v363_v23, %v298_v33  ;;  %v231_v38 = vmul.f32 0.5, %v230_v34 }
 0x14c   :  { %v273_v41 = vsel %vm272_vm3, %v361_v22, %v269_v35 }
 0x14d   :  { %v274_v42 = vmul.f32 %v273_v41, %v262_v36  ;;  %v232_v43 = vsub.f32 1.5, %v231_v38  ;;  %v303_v45 = vsel %vm302_vm5, %v363_v23, %v299_v37 }
 0x14e   :  { %v304_v47 = vmul.f32 %v303_v45, %v292_v40 }
 0x14f   :  { %v233_v48 = vmul.f32 %v365_v28, %v232_v43  ;;  %v275_v49 = vmul.f32 %v357_v39, %v274_v42 }
 0x150   :  { %v305_v51 = vmul.f32 %v357_v39, %v304_v47 }
 0x151   :  { %v276_v52 = vadd.f32 %v358_v44, %v275_v49  ;;  %v237_v54 = vsel %vm236_vm8, %v365_v28, %v233_v48 }
 0x152   :  { %v306_v55 = vadd.f32 %v358_v44, %v305_v51  ;;  %v238_v58 = vmul.f32 %v237_v54, %v226_v50 }
 0x153   :  { %v277_v59 = vmax.f32 %v276_v52, 0.0 }
 0x154   :  { %v307_v60 = vmax.f32 %v306_v55, 0.0  ;;  %v242_v61 = vmul.f32 %v357_v39, %v238_v58 }
 0x155   :  { %v279_v62 = vmul.f32 %v278_v53, %v277_v59 }
 0x156   :  { %v309_v63 = vmul.f32 %v308_v57, %v307_v60  ;;  %v246_v0 = vadd.f32 %v358_v44, %v242_v61 }
 0x157   :  { %280 = vadd.xlane.f32.xlu1 %v279_v62 }
 0x158   :  { %310 = vadd.xlane.f32.xlu2 %v309_v63  ;;  %v247_v2 = vmax.f32 %v246_v0, 0.0 }
 0x15a   :  { %v249_v3 = vmul.f32 %v248_v1, %v247_v2 }
 0x15c   :  { %250 = vadd.xlane.f32.xlu0 %v249_v3 }
 0x1ca   :  { %v281_v4 = vpop.xlane.xlu1 %280 }
 0x1cb   :  { %v311_v6 = vpop.xlane.xlu2 %310 }
 0x1cf   :  { %v251_v5 = vpop.xlane.xlu0 %250 }
 0x1d0   :  { %v313_v7 = vsel %vm312_vm9, %v251_v5, %v281_v4 }
 0x1d1   :  { %v315_v8 = vsel %vm314_vm10, %v313_v7, %v311_v6 }
 0x1d2   :  { %v320_v9 = vadd.f32 %v359_v56, %v315_v8 }
 0x1d4   :  { %v349_v10 = vmul.f32 -1.442695, %v320_v9 }
 0x1d6   :  { %366 = vpow2.f32 %v349_v10 }
 0x1dc   :  { %v367_v11 = vpop.eup %366 }
 0x1dd   :  { %v324_v12 = vadd.f32 1.0, %v367_v11 }
 0x1df   :  { %368 = vrcp.f32 %v324_v12  ;;  %v336_v16 = vand.u32 2147483648, %v324_v12  ;;  %v334_v18 = vand.u32 2147483647, %v324_v12  ;;  %vm330_vm12 = vweird.f32 %v324_v12 }
 0x1e1   :  { %v337_v20 = vor.u32 1.1754944e-38, %v336_v16  ;;  %vm335_vm15 = vcmp.eq.f32.partialorder %v334_v18, 8.507059e+37 }
 0x1e5   :  { %v369_v13 = vpop.eup %368 }
 0x1e6   :  { %v326_v14 = vmul.f32 %v369_v13, %v324_v12  ;;  %vm331_vm11 = vweird.f32 %v369_v13 }
 0x1e7   :  { %vm332_vm14 = vmor %vm330_vm12, %vm331_vm11 }
 0x1e8   :  { %v327_v15 = vsub.f32 1.0, %v326_v14 }
 0x1ea   :  { %v328_v17 = vmul.f32 %v369_v13, %v327_v15 }
 0x1ec   :  { %v329_v19 = vadd.f32 %v369_v13, %v328_v17 }
 0x1ee   :  { %v333_v21 = vsel %vm332_vm14, %v369_v13, %v329_v19 }
 0x1ef   :  { %v338_v22 = vsel %vm335_vm15, %v337_v20, %v333_v21 }
 0x1f0   :  { %341 = vst.msk [vmem:[%s592_s7] sm:$0xff] %vm340_vm13, %v338_v22 }
 0x1f1   :  { %346 = vsyncpa [#allocation3], 1 }
 0x1f2   :  { %347 = vsyncpa [#allocation5], 1 }
 0x1f3   :  { %348 = vsyncpa [#allocation8], 1 }

</bundles_post_ra>
